<compile_context>
chip_gen: v6e
topology: v6e:2x2x1
jax: 0.10.0
libtpu: 0.0.40
codegen_flags: <defaults>
</compile_context>

<pallas_src>
import functools

import jax
import jax.numpy as jnp
from jax.experimental import pallas as pl
from jax.experimental.pallas import tpu as pltpu


def _snapshotter_kernel(snapshot_ref, update_ref, x_ref, new_snap_ref, *, state_size):
    """Write x = [snapshot | update] and new_snap = x[:, -state_size:].

    Refs are 2-D [rows, time] VMEM blocks. All offsets are static Python ints,
    so every store is a plain (possibly masked at the seam) slab store -- no
    in-register concatenation / vreg splicing, and no hoisted full-tile copy
    of the update (each store site reads its source ref directly).
    """
    S = snapshot_ref.shape[-1]
    U = update_ref.shape[-1]
    total = S + U

    # x = [snapshot | update]: two direct stores.
    x_ref[:, :S] = snapshot_ref[...]
    x_ref[:, S:] = update_ref[...]

    # new_snap = x[:, total - state_size:], sourced straight from the inputs.
    offset = total - state_size            # static, >= 0 (state_size clamped)
    if offset <= S:
        keep = S - offset                  # old-snapshot samples that survive
        if keep > 0:
            new_snap_ref[:, :keep] = snapshot_ref[:, offset:]
        new_snap_ref[:, keep:] = update_ref[...]
    else:
        # state_size < U: new snapshot comes entirely from the update.
        new_snap_ref[...] = update_ref[:, offset - S:]


def _vmem_capacity_bytes() -> int:
    """Per-core VMEM capacity; falls back to 128 MiB if the query fails."""
    try:
        return int(pltpu.get_tpu_info().vmem_capacity_bytes)
    except Exception:
        return 128 << 20


def _pick_block_rows(n_rows: int, row_bytes: int, budget: int) -> int:
    """Row-tile size (multiple of 8) whose double-buffered working set fits
    `budget`, forced to give >= 2 grid steps when there are enough rows so the
    parallel axis can shard across v7x's two TensorCores."""
    n8 = ((n_rows + 7) // 8) * 8
    max_rows = max(8, (budget // max(row_bytes, 1)) // 8 * 8)
    block = min(n8, max_rows)
    if n8 >= 16 and block >= n8:
        block = ((n8 // 2 + 7) // 8) * 8
    return block


class BackgroundSnapshotter:
    """JAX/Pallas port of the PyTorch BackgroundSnapshotter module."""

    def __init__(self, psd_length, kernel_length, fduration, sample_rate,
                 inference_sampling_rate):
        state_length = kernel_length + fduration + psd_length
        state_length -= 1 / inference_sampling_rate
        # Truncating int() matches the PyTorch module exactly.
        self.state_size = int(state_length * sample_rate)

    def __call__(self, update: jax.Array, snapshot: jax.Array):
        assert update.ndim == 3 and snapshot.ndim == 3, "expected [B, C, T] inputs"
        B, C, U = update.shape
        Bs, Cs, S = snapshot.shape
        assert (B, C) == (Bs, Cs), "batch/channel dims of update & snapshot differ"
        assert update.dtype == snapshot.dtype, "update/snapshot dtypes differ"

        total = S + U
        # PyTorch's x[:, :, -state_size:] clamps when state_size > total.
        eff_state = min(self.state_size, total)
        assert eff_state > 0, "state_size must be positive"

        # Flatten [B, C, T] -> [B*C, T]: dense sublane packing, free reshape.
        R = B * C
        snap2 = snapshot.reshape(R, S)
        upd2 = update.reshape(R, U)

        itemsize = jnp.dtype(update.dtype).itemsize
        # Per-row working set: double-buffered input + output blocks.
        row_bytes = 2 * (S + U + total + eff_state) * itemsize

        # Generation-aware VMEM budget (v5e/v6e: 128 MiB, v7x: 64 MiB per TC),
        # kept well under the scoped limit we request below.
        capacity = _vmem_capacity_bytes()
        budget = max(8 << 20, min(20 << 20, capacity // 6))
        block_r = _pick_block_rows(R, row_bytes, budget)

        # Pad rows (zero rows, stripped after) so block_r divides the row
        # count exactly and every vreg/store uses all 8 sublanes.
        n_blocks = pl.cdiv(R, block_r)
        R_pad = n_blocks * block_r
        if R_pad != R:
            pad = R_pad - R
            snap2 = jnp.pad(snap2, ((0, pad), (0, 0)))
            upd2 = jnp.pad(upd2, ((0, pad), (0, 0)))

        block_bytes = block_r * (S + U + total + eff_state) * itemsize * 2
        vmem_limit = int(min(capacity * 3 // 4, max(block_bytes + (4 << 20), 16 << 20)))

        kernel = functools.partial(_snapshotter_kernel, state_size=eff_state)

        # Streaming steady state: new snapshot has the same shape as the old
        # one, so alias the buffers (a donating jitted caller then updates its
        # state in place; otherwise XLA inserts a copy and semantics hold).
        io_aliases = {0: 1} if eff_state == S else {}

        bytes_accessed = R_pad * (S + U + total + eff_state) * itemsize
        cost = pl.CostEstimate(flops=0, transcendentals=0,
                               bytes_accessed=bytes_accessed)

        x2, new_snap2 = pl.pallas_call(
            kernel,
            out_shape=(
                jax.ShapeDtypeStruct((R_pad, total), update.dtype),
                jax.ShapeDtypeStruct((R_pad, eff_state), update.dtype),
            ),
            grid=(n_blocks,),
            in_specs=[
                pl.BlockSpec((block_r, S), lambda i: (i, 0)),
                pl.BlockSpec((block_r, U), lambda i: (i, 0)),
            ],
            out_specs=(
                pl.BlockSpec((block_r, total), lambda i: (i, 0)),
                pl.BlockSpec((block_r, eff_state), lambda i: (i, 0)),
            ),
            input_output_aliases=io_aliases,
            cost_estimate=cost,
            compiler_params=pltpu.CompilerParams(
                dimension_semantics=("parallel",),
                vmem_limit_bytes=vmem_limit,
            ),
        )(snap2, upd2)

        if R_pad != R:
            x2 = x2[:R]
            new_snap2 = new_snap2[:R]

        return (x2.reshape(B, C, total),
                new_snap2.reshape(B, C, eff_state))


def _reference(update, snapshot, state_size):
    x = jnp.concatenate([snapshot, update], axis=-1)
    return x, x[:, :, -state_size:]


if __name__ == "__main__":
    # state_length = 1 + 1 + 2 - 1/16 = 3.9375 s; state_size = 504 samples.
    psd_length = 2.0
    kernel_length = 1.0
    fduration = 1.0
    sample_rate = 128.0
    inference_sampling_rate = 16.0

    snapshotter = BackgroundSnapshotter(
        psd_length, kernel_length, fduration, sample_rate, inference_sampling_rate
    )

    B, C = 2, 2                                      # batch, interferometer channels
    U = int(sample_rate / inference_sampling_rate)   # 8 new samples per step
    S = snapshotter.state_size                       # 504 samples of prior state

    key = jax.random.PRNGKey(0)
    k1, k2 = jax.random.split(key)
    update = jax.random.normal(k1, (B, C, U), dtype=jnp.float32)
    snapshot = jax.random.normal(k2, (B, C, S), dtype=jnp.float32)

    # Reference computed up-front (pure JAX), before the kernel runs.
    x_ref, snap_ref = _reference(update, snapshot, snapshotter.state_size)

    x, new_snap = snapshotter(update, snapshot)
    jax.block_until_ready((x, new_snap))

    assert x.shape == (B, C, S + U)
    assert new_snap.shape == (B, C, snapshotter.state_size)
    assert jnp.array_equal(x, x_ref)
    assert jnp.array_equal(new_snap, snap_ref)

    print("KERNEL_OK")
</pallas_src>

<mosaic_0001>
module attributes {stable_mosaic.version = 11 : i64} {
  func.func @_snapshotter_kernel(%arg0: i32, %arg1: memref<8x504xf32, #tpu.memory_space<vmem>>, %arg2: memref<8x8xf32, #tpu.memory_space<vmem>>, %arg3: memref<8x512xf32, #tpu.memory_space<vmem>>, %arg4: memref<8x504xf32, #tpu.memory_space<vmem>>) attributes {dimension_semantics = [#tpu.dimension_semantics<parallel>], iteration_bounds = array<i64: 1>, scalar_prefetch = 0 : i64, scratch_operands = 0 : i64, tpu.core_type = #tpu.core_type<tc>, window_params = [{transform_indices = @transform_0, window_bounds = array<i64: 8, 504>}, {transform_indices = @transform_1, window_bounds = array<i64: 8, 8>}, {transform_indices = @transform_2, window_bounds = array<i64: 8, 512>}, {transform_indices = @transform_3, window_bounds = array<i64: 8, 504>}]} {
    %c0 = arith.constant 0 : index
    %c0_0 = arith.constant 0 : index
    %0 = vector.load %arg1[%c0, %c0_0] : memref<8x504xf32, #tpu.memory_space<vmem>>, vector<8x504xf32>
    %c0_1 = arith.constant 0 : index
    %c0_2 = arith.constant 0 : index
    %1 = vector.load %arg3[%c0_1, %c0_2] : memref<8x512xf32, #tpu.memory_space<vmem>>, vector<8x504xf32>
    tpu.vector_store %arg3[%c0_1, %c0_2], %0 {strides = array<i32>} : memref<8x512xf32, #tpu.memory_space<vmem>>, vector<8x504xf32>,
    %c0_3 = arith.constant 0 : index
    %c0_4 = arith.constant 0 : index
    %2 = vector.load %arg2[%c0_3, %c0_4] : memref<8x8xf32, #tpu.memory_space<vmem>>, vector<8x8xf32>
    %c0_5 = arith.constant 0 : index
    %c504 = arith.constant 504 : index
    %3 = vector.load %arg3[%c0_5, %c504] : memref<8x512xf32, #tpu.memory_space<vmem>>, vector<8x8xf32>
    tpu.vector_store %arg3[%c0_5, %c504], %2 {strides = array<i32>} : memref<8x512xf32, #tpu.memory_space<vmem>>, vector<8x8xf32>,
    %c0_6 = arith.constant 0 : index
    %c8 = arith.constant 8 : index
    %4 = vector.load %arg1[%c0_6, %c8] : memref<8x504xf32, #tpu.memory_space<vmem>>, vector<8x496xf32>
    %c0_7 = arith.constant 0 : index
    %c0_8 = arith.constant 0 : index
    %5 = vector.load %arg4[%c0_7, %c0_8] : memref<8x504xf32, #tpu.memory_space<vmem>>, vector<8x496xf32>
    tpu.vector_store %arg4[%c0_7, %c0_8], %4 {strides = array<i32>} : memref<8x504xf32, #tpu.memory_space<vmem>>, vector<8x496xf32>,
    %c0_9 = arith.constant 0 : index
    %c0_10 = arith.constant 0 : index
    %6 = vector.load %arg2[%c0_9, %c0_10] : memref<8x8xf32, #tpu.memory_space<vmem>>, vector<8x8xf32>
    %c0_11 = arith.constant 0 : index
    %c496 = arith.constant 496 : index
    %7 = vector.load %arg4[%c0_11, %c496] : memref<8x504xf32, #tpu.memory_space<vmem>>, vector<8x8xf32>
    tpu.vector_store %arg4[%c0_11, %c496], %6 {strides = array<i32>} : memref<8x504xf32, #tpu.memory_space<vmem>>, vector<8x8xf32>,
    return
  }
  func.func @transform_0(%arg0: i32) -> (i32, i32) {
    %c0_i32 = arith.constant 0 : i32
    %c0_i32_0 = arith.constant 0 : i32
    return %arg0, %c0_i32 : i32, i32
  }
  func.func @transform_1(%arg0: i32) -> (i32, i32) {
    %c0_i32 = arith.constant 0 : i32
    %c0_i32_0 = arith.constant 0 : i32
    return %arg0, %c0_i32 : i32, i32
  }
  func.func @transform_2(%arg0: i32) -> (i32, i32) {
    %c0_i32 = arith.constant 0 : i32
    %c0_i32_0 = arith.constant 0 : i32
    return %arg0, %c0_i32 : i32, i32
  }
  func.func @transform_3(%arg0: i32) -> (i32, i32) {
    %c0_i32 = arith.constant 0 : i32
    %c0_i32_0 = arith.constant 0 : i32
    return %arg0, %c0_i32 : i32, i32
  }
}

</mosaic_0001>

<bundles_post_ra>
// kernel: tpu_custom_call.1
= control target key start
LH: loop header
LB: loop body
LE: loop exit
PB: predicated region body
PF: predicated region fallthrough
CT: control target
= control target key end

     0   :  { %9 = vsyncpa [#allocation3], 0  ;;  %s219_s0 = inlined_call_operand.hbm [shape: f32[8,504], index: 0, kind: input, shape index: {}, may-alias: {0,3}]   ;;  %s220_s1 = inlined_call_operand.vmem [shape: f32[8,8], index: 1, kind: input, shape index: {}]   ;;  %s221_s2 = inlined_call_operand.hbm [shape: f32[8,512], index: 2, kind: output, shape index: {0}]   ;;  %s222_s3 = inlined_call_operand.hbm [shape: f32[8,504], index: 3, kind: output, shape index: {1}, may-alias: {0,3}]  }
   0x1   :  { %10 = vsyncpa [#allocation4], 0 }
   0x2   :  { %11 = vsyncpa [#allocation7], 0  ;;  %s178_s12 = smov [#allocation2]  }
   0x3   :  { %s18_s13 = sshll.u32 %s178_s12, 4  ;;  %s19_s13 = int_to_ptr.vmem [resolvable:$true] %s18_s13 }
   0x4   :  { %s120_s14 = scalar_lea.vmem %s19_s13, 512  ;;  %p125_p1 = scmp.lt.s32.totalorder %s19_s13, %s19_s13 }
   0x5   :  { %p121_p0 = scmp.ne.s32.totalorder %s19_s13, %s120_s14  ;;  %p126_p2 = scmp.lt.s32.totalorder %s120_s14, %s120_s14 }
   0x7   :  { %p127_p3 = por %p126_p2, %p125_p1 }
   0x9   :  { %p128_p4 = pnand %p127_p3, %p121_p0 }
   0xb   :  { %131 = shalt.err (!%p128_p4)
}
   0xc   :  { %21 = dma.hbm_to_vmem [thread:$0]  %s219_s0, 512, %s19_s13, [#allocation3]  }
   0xd   :  { %172 = dma.done.wait [#allocation3], 512  }
   0xe   :  { %173 = vsyncadd [#allocation3], 4294966784  ;;  %v45_v0 = vld [vmem:[#allocation2 + $0x10] sm:$0xff]  ;;  %v43_v1 = vld [vmem:[#allocation2] sm:$0xff]  ;;  %vm34_vm0 = vcmask 982016   ;;  %s179_s17 = smov 120  }
   0xf   :  { %v46_v2 = vld [vmem:[#allocation2 + $0x18] sm:$0xff]  ;;  %55 = vrot.lane.b32.xlu1 %v45_v0, %s179_s17  ;;  %51 = vrot.lane.b32.xlu0 %v43_v1, %s179_s17  ;;  %v44_v3 = vld [vmem:[#allocation2 + $0x8] sm:$0xff]  ;;  %31 = vst [vmem:[#allocation5] sm:$0xff] %v43_v1  ;;  %33 = vst [vmem:[#allocation5 + $0x10] sm:$0xff] %v45_v0  ;;  %s180_s0 = smov 112   ;;  %vm69_vm1 = vcmask 916480  }
  0x10   :  { %35 = vst.msk [vmem:[#allocation5 + $0x18] sm:$0xff] %vm34_vm0, %v46_v2  ;;  %32 = vst [vmem:[#allocation5 + $0x8] sm:$0xff] %v44_v3  ;;  %v71_v4 = vld [vmem:[%s220_s1] sm:$0xff]  ;;  %s181_s20 = smov [#allocation5]   ;;  %s182_s22 = smov [#allocation6]   ;;  %vm76_vm2 = vcmask 982912  }
  0x11   :  { %s84_s21 = sshll.u32 %s181_s20, 4  ;;  %s94_s23 = sshll.u32 %s182_s22, 4  ;;  %vm41_vm3 = vcmask 1048512   ;;  %s85_s21 = int_to_ptr.vmem [resolvable:$true] %s84_s21  ;;  %s95_s23 = int_to_ptr.vmem [resolvable:$true] %s94_s23 }
  0x12   :  { %s132_s1 = scalar_lea.vmem %s85_s21, 512  ;;  %p137_p6 = scmp.lt.s32.totalorder %s85_s21, %s85_s21 }
  0x13   :  { %57 = vrot.lane.b32.xlu1 %v46_v2, %s179_s17  ;;  %53 = vrot.lane.b32.xlu0 %v44_v3, %s179_s17  ;;  %p133_p5 = scmp.ne.s32.totalorder %s85_s21, %s132_s1  ;;  %p138_p7 = scmp.lt.s32.totalorder %s132_s1, %s132_s1 }
  0x15   :  { %p139_p8 = por %p138_p7, %p137_p6 }
  0x17   :  { %73 = vrot.lane.b32.xlu1 %v71_v4, %s180_s0  ;;  %38 = vrot.lane.b32.xlu0 %v71_v4, %s179_s17  ;;  %p140_p9 = pnand %p139_p8, %p133_p5 }
  0x81   :  { %v56_v5 = vpop.permute.xlu1 %55  ;;  %v52_v6 = vpop.permute.xlu0 %51 }
  0x85   :  { %v58_v7 = vpop.permute.xlu1 %57  ;;  %v54_v8 = vpop.permute.xlu0 %53 }
  0x86   :  { %v61_v9 = vsel %vm34_vm0, %v56_v5, %v58_v7  ;;  %70 = vst.msk [vmem:[#allocation6 + $0x18] sm:$0xff] %vm69_vm1, %v58_v7  ;;  %v59_v10 = vsel %vm34_vm0, %v52_v6, %v54_v8  ;;  %v60_v11 = vsel %vm34_vm0, %v54_v8, %v56_v5 }
  0x87   :  { %68 = vst [vmem:[#allocation6 + $0x10] sm:$0xff] %v61_v9  ;;  %66 = vst [vmem:[#allocation6] sm:$0xff] %v59_v10 }
  0x88   :  { %67 = vst [vmem:[#allocation6 + $0x8] sm:$0xff] %v60_v11 }
  0x89   :  { %v74_v12 = vpop.permute.xlu1 %73  ;;  %v39_v13 = vpop.permute.xlu0 %38 }
  0x8a   :  { %77 = vst.msk [vmem:[#allocation6 + $0x18] sm:$0xff] %vm76_vm2, %v74_v12 }
  0x8b   :  { %42 = vst.msk [vmem:[#allocation5 + $0x18] sm:$0xff] %vm41_vm3, %v39_v13 }
  0x8c   :  { %143 = shalt.err (!%p140_p9)
}
  0x8d   :  { %87 = dma.vmem_to_hbm [thread:$0]  %s85_s21, 512, %s221_s2, [#allocation4]  }
  0x8e   :  { %s152_s26 = scalar_lea.vmem %s95_s23, 512  ;;  %p157_p11 = scmp.lt.s32.totalorder %s95_s23, %s95_s23 }
  0x8f   :  { %p153_p10 = scmp.ne.s32.totalorder %s95_s23, %s152_s26  ;;  %p158_p12 = scmp.lt.s32.totalorder %s152_s26, %s152_s26 }
  0x91   :  { %p159_p13 = por %p158_p12, %p157_p11 }
  0x93   :  { %p160_p0 = pnand %p159_p13, %p153_p10 }
  0x95   :  { %163 = shalt.err (!%p160_p0)
}
  0x96   :  { %97 = dma.vmem_to_hbm [thread:$0]  %s95_s23, 512, %s222_s3, [#allocation7]  }
  0x97   :  { %174 = dma.done.wait [#allocation4], 512  }
  0x98   :  { %175 = vsyncadd [#allocation4], 4294966784 }
  0x99   :  { %176 = dma.done.wait [#allocation7], 512  }
  0x9a   :  { %177 = vsyncadd [#allocation7], 4294966784 }
  0x9b   :  { %104 = vsyncpa [#allocation3], 1 }
  0x9c   :  { %105 = vsyncpa [#allocation4], 1 }
  0x9d   :  { %106 = vsyncpa [#allocation7], 1 }

</bundles_post_ra>
